<compile_context>
chip_gen: v6e
topology: v6e:2x2x1
jax: 0.10.0
libtpu: 0.0.40
codegen_flags: <defaults>
</compile_context>

<pallas_src>
import math
import functools

import jax
import jax.numpy as jnp
from jax.experimental import pallas as pl
from jax.experimental.pallas import tpu as pltpu


class SequenceTooLongError(Exception):
    pass


# VMEM budgets: sized so the pipeline (double-buffered emb-in + out + pe)
# fits comfortably on v7x (64 MiB physical / 32 MiB default scoped) while
# still giving multi-MiB blocks on v5e/v6e.
_TILE_VMEM_BUDGET = 32 * 1024 * 1024
_VMEM_LIMIT_BYTES = 48 * 1024 * 1024


def make_sinusoidal_pe(max_len, dim, dtype=jnp.float32):
    """Same construction as the PyTorch buffer, shape (max_len, dim)."""
    if dim % 2 != 0:
        raise ValueError(
            f"Cannot use sin/cos positional encoding with odd dim (got dim={dim})")
    position = jnp.arange(max_len, dtype=jnp.float32)[:, None]            # (max_len, 1)
    div_term = jnp.exp(jnp.arange(0, dim, 2, dtype=jnp.float32)
                       * -(math.log(10000.0) / dim))                       # (dim//2,)
    angles = position * div_term[None, :]                                  # (max_len, dim//2)
    pe = jnp.zeros((max_len, dim), dtype=jnp.float32)
    pe = pe.at[:, 0::2].set(jnp.sin(angles))
    pe = pe.at[:, 1::2].set(jnp.cos(angles))
    return pe.astype(dtype)


# --------------------------------------------------------------------------
# Kernels (first arg is the scalar-prefetched step offset; only the
# index_maps consume it, the body ignores it).
# --------------------------------------------------------------------------
def _pe_kernel_native(step_ref, emb_ref, pe_ref, out_ref, *, scale):
    del step_ref
    pe = pe_ref[...]                                        # (tseq, dim), emb dtype
    out_ref[...] = (emb_ref[...] * jnp.asarray(scale, dtype=emb_ref.dtype)
                    + pe[:, None, :])                       # broadcast over batch


def _pe_kernel_folded(step_ref, emb_ref, pe_ref, out_ref, *, scale, batch):
    del step_ref
    pe = pe_ref[...]                                        # (tseq, dim)
    if batch > 1:
        # lane replication in VMEM (cheap, hidden under the HBM stream);
        # avoids shipping a batch-tiled pe from HBM.
        pe = jnp.concatenate([pe] * batch, axis=-1)         # (tseq, batch*dim)
    out_ref[...] = emb_ref[...] * jnp.asarray(scale, dtype=emb_ref.dtype) + pe


def _round_up(x, m):
    return ((x + m - 1) // m) * m


def positional_encoding(emb, pe, *, dim, step=None, donate_emb=False):
    """emb: (seq_len, batch, dim) ; pe: (max_len, dim) (ideally already emb.dtype)."""
    seq_len, batch, d = emb.shape
    assert d == dim
    max_len = pe.shape[0]

    static_step = step is None or isinstance(step, int)
    step_val = 0 if step is None else step
    if static_step:
        step_val = int(step_val)
        if max_len < step_val + seq_len:
            raise SequenceTooLongError(
                f"Sequence is {seq_len + step_val} but PositionalEncoding is limited "
                f"to {max_len}. See max_len argument.")
    # TODO(synk): a traced `step` skips the max_len bounds check (needs a concrete value).

    # Cast the table once (no-op when already emb.dtype) -> no per-block convert,
    # half the pe DMA traffic when emb is bf16.
    pe = pe.astype(emb.dtype)
    ebytes = jnp.dtype(emb.dtype).itemsize

    # ---- seq-tile selection: pure HBM streaming, so pick the largest 8-aligned
    # tile that fits the VMEM budget, but keep >= 2 grid steps for v7x megacore.
    row_bytes = batch * dim * ebytes            # one seq row of emb / out
    pe_row_bytes = dim * ebytes
    if seq_len < 8:
        tseq = seq_len                          # decode-style tiny sequences
    else:
        per_row = 4 * row_bytes + 2 * pe_row_bytes   # 2x emb-in + 2x out + 2x pe
        tseq = max(8, (_TILE_VMEM_BUDGET // per_row) // 8 * 8)
        if seq_len >= 16:
            tseq = min(tseq, _round_up(pl.cdiv(seq_len, 2), 8))
        tseq = min(tseq, (seq_len // 8) * 8)
    grid = (pl.cdiv(seq_len, tseq),)
    scale = math.sqrt(dim)

    # ---- step offset: scalar-prefetched block offset into the full pe table
    # (no wrapper dynamic_slice). Valid when step is block-aligned, which covers
    # step=0 training and seq_len=1 decode; otherwise fall back to a slice.
    aligned = (tseq == 1) or (static_step and tseq % 8 == 0 and step_val % tseq == 0)
    if aligned:
        pe_in = pe
        if static_step:
            step_blocks = jnp.asarray([step_val // tseq], dtype=jnp.int32)
        else:
            step_blocks = (jnp.asarray(step, dtype=jnp.int32) // tseq).reshape(1)
    else:
        start = step_val if static_step else step
        pe_in = jax.lax.dynamic_slice(pe, (start, 0), (seq_len, dim))
        step_blocks = jnp.zeros((1,), jnp.int32)

    # ---- layout: for small batch the (batch, dim) trailing pair wastes sublanes,
    # so fold to a lane-dense (seq, batch*dim) layout (free reshape on contiguous
    # data) and replicate pe across batch inside the kernel.
    fold = batch < 8
    if fold:
        emb_in = emb.reshape(seq_len, batch * dim)
        kernel = functools.partial(_pe_kernel_folded, scale=scale, batch=batch)
        data_block = (tseq, batch * dim)
        data_map = lambda s, step_ref: (s, 0)
        out_shape = jax.ShapeDtypeStruct((seq_len, batch * dim), emb.dtype)
    else:
        emb_in = emb
        kernel = functools.partial(_pe_kernel_native, scale=scale)
        data_block = (tseq, batch, dim)
        data_map = lambda s, step_ref: (s, 0, 0)
        out_shape = jax.ShapeDtypeStruct((seq_len, batch, dim), emb.dtype)

    out = pl.pallas_call(
        kernel,
        out_shape=out_shape,
        grid_spec=pltpu.PrefetchScalarGridSpec(
            num_scalar_prefetch=1,
            grid=grid,
            in_specs=[
                pl.BlockSpec(data_block, data_map),
                pl.BlockSpec((tseq, dim), lambda s, step_ref: (step_ref[0] + s, 0)),
            ],
            out_specs=pl.BlockSpec(data_block, data_map),
        ),
        compiler_params=pltpu.CompilerParams(
            dimension_semantics=("parallel",),
            vmem_limit_bytes=_VMEM_LIMIT_BYTES),
        # inputs are (step_blocks, emb, pe) -> emb is input index 1.
        input_output_aliases={1: 0} if donate_emb else {},
    )(step_blocks, emb_in, pe_in)

    return out.reshape(seq_len, batch, dim) if fold else out


if __name__ == "__main__":
    # --- small-batch / folded-layout path (batch < 8, dim < 128) ---
    seq_len, batch, dim = 8, 2, 32
    max_len = 64  # small synthetic max_len (module default is 5000)

    key = jax.random.PRNGKey(0)
    emb = jax.random.normal(key, (seq_len, batch, dim), dtype=jnp.float32)
    pe = make_sinusoidal_pe(max_len, dim, dtype=emb.dtype)

    out = jax.block_until_ready(positional_encoding(emb, pe, dim=dim, step=None))
    ref = emb * math.sqrt(dim) + pe[:seq_len][:, None, :]
    assert out.shape == (seq_len, batch, dim)
    assert jnp.allclose(out, ref, atol=1e-5, rtol=1e-5)

    # --- stepwise decode path (seq_len = 1, step = 3): scalar-prefetched offset ---
    emb1 = emb[:1]
    out1 = jax.block_until_ready(positional_encoding(emb1, pe, dim=dim, step=3))
    ref1 = emb1 * math.sqrt(dim) + pe[3:4][:, None, :]
    assert jnp.allclose(out1, ref1, atol=1e-5, rtol=1e-5)

    # --- native (unfolded) layout path, multi-step parallel grid ---
    seq2, b2, d2 = 16, 8, 128
    emb2 = jax.random.normal(jax.random.PRNGKey(1), (seq2, b2, d2), dtype=jnp.float32)
    pe2 = make_sinusoidal_pe(64, d2, dtype=emb2.dtype)
    out2 = jax.block_until_ready(positional_encoding(emb2, pe2, dim=d2, step=0))
    ref2 = emb2 * math.sqrt(d2) + pe2[:seq2][:, None, :]
    assert jnp.allclose(out2, ref2, atol=1e-5, rtol=1e-5)

    print("KERNEL_OK")
</pallas_src>

<mosaic_0001>
module attributes {stable_mosaic.version = 11 : i64} {
  func.func @_pe_kernel_folded(%arg0: i32, %arg1: memref<1xi32, #tpu.memory_space<smem>>, %arg2: memref<8x64xf32, #tpu.memory_space<vmem>>, %arg3: memref<8x32xf32, #tpu.memory_space<vmem>>, %arg4: memref<8x64xf32, #tpu.memory_space<vmem>>) attributes {dimension_semantics = [#tpu.dimension_semantics<parallel>], iteration_bounds = array<i64: 1>, scalar_prefetch = 1 : i64, scratch_operands = 0 : i64, tpu.core_type = #tpu.core_type<tc>, window_params = [{transform_indices = @transform_0, window_bounds = array<i64: 8, 64>}, {transform_indices = @transform_1, window_bounds = array<i64: 8, 32>}, {transform_indices = @transform_2, window_bounds = array<i64: 8, 64>}]} {
    %c0 = arith.constant 0 : index
    %c0_0 = arith.constant 0 : index
    %0 = vector.load %arg3[%c0, %c0_0] : memref<8x32xf32, #tpu.memory_space<vmem>>, vector<8x32xf32>
    %1 = tpu.concatenate %0, %0 in 1 : vector<8x32xf32>, vector<8x32xf32> -> vector<8x64xf32>
    %c0_1 = arith.constant 0 : index
    %c0_2 = arith.constant 0 : index
    %2 = vector.load %arg2[%c0_1, %c0_2] : memref<8x64xf32, #tpu.memory_space<vmem>>, vector<8x64xf32>
    %cst = arith.constant 5.65685415 : f32
    %3 = vector.broadcast %cst : f32 to vector<8x64xf32>
    %4 = arith.mulf %2, %3 : vector<8x64xf32>
    %5 = arith.addf %4, %1 : vector<8x64xf32>
    %c0_3 = arith.constant 0 : index
    %c0_4 = arith.constant 0 : index
    %6 = vector.load %arg4[%c0_3, %c0_4] : memref<8x64xf32, #tpu.memory_space<vmem>>, vector<8x64xf32>
    tpu.vector_store %arg4[%c0_3, %c0_4], %5 {strides = array<i32>} : memref<8x64xf32, #tpu.memory_space<vmem>>, vector<8x64xf32>,
    return
  }
  func.func @transform_0(%arg0: i32, %arg1: memref<1xi32, #tpu.memory_space<smem>>) -> (i32, i32) {
    %c0_i32 = arith.constant 0 : i32
    %c0_i32_0 = arith.constant 0 : i32
    return %arg0, %c0_i32 : i32, i32
  }
  func.func @transform_1(%arg0: i32, %arg1: memref<1xi32, #tpu.memory_space<smem>>) -> (i32, i32) {
    %c0 = arith.constant 0 : index
    %0 = memref.load %arg1[%c0] : memref<1xi32, #tpu.memory_space<smem>>
    %1 = arith.addi %0, %arg0 : i32
    %c0_i32 = arith.constant 0 : i32
    %c0_i32_0 = arith.constant 0 : i32
    return %1, %c0_i32 : i32, i32
  }
  func.func @transform_2(%arg0: i32, %arg1: memref<1xi32, #tpu.memory_space<smem>>) -> (i32, i32) {
    %c0_i32 = arith.constant 0 : i32
    %c0_i32_0 = arith.constant 0 : i32
    return %arg0, %c0_i32 : i32, i32
  }
}

</mosaic_0001>

<bundles_post_ra>
// kernel: tpu_custom_call.1
= control target key start
LH: loop header
LB: loop body
LE: loop exit
PB: predicated region body
PF: predicated region fallthrough
CT: control target
= control target key end

     0   :  { %s130_s0 = inlined_call_operand.<no memory space> [shape: s32[1], index: 0, kind: input, shape index: {}]   ;;  %s131_s1 = inlined_call_operand.vmem [shape: f32[8,64], index: 1, kind: input, shape index: {}]   ;;  %s132_s2 = inlined_call_operand.vmem [shape: f32[64,32], index: 2, kind: input, shape index: {}]   ;;  %s133_s3 = inlined_call_operand.hbm [shape: f32[8,64], index: 3, kind: output, shape index: {}]  }
   0x1   :  { %p30_p0 = scmp.lt.s32.totalorder %s130_s0, 7 }
   0x2   :  { %9 = vsyncpa [#allocation5], 0  ;;  %s93_s20 = smov 32   ;;  %v43_v1 = vld [vmem:[%s131_s1] sm:$0xff]  ;;  %vm41_vm0 = vcmask 261120   ;;  %s94_s23 = smov [#allocation4]  }
   0x3   :  { %s135_s0 = smov (!%p30_p0, %s130_s0), 7  ;;  %v44_v2 = vmul.f32 5.656854, %v43_v1  ;;  %s54_s24 = sshll.u32 %s94_s23, 4  ;;  %vm46_vm1 = vcmask 523264   ;;  %s55_s24 = int_to_ptr.vmem [resolvable:$true] %s54_s24 }
   0x4   :  { %s68_s16 = sshll.u32 %s135_s0, 3  ;;  %s71_s0 = scalar_lea.vmem %s55_s24, 128 }
   0x5   :  { %s33_s19 = scalar_lea.vmem %s132_s2, %s68_s16  ;;  %p72_p1 = scmp.ne.s32.totalorder %s55_s24, %s71_s0 }
   0x6   :  { %v36_v0 = vld [vmem:[%s33_s19] sm:$0xff]  ;;  %p76_p2 = scmp.lt.s32.totalorder %s55_s24, %s55_s24  ;;  %p77_p3 = scmp.lt.s32.totalorder %s71_s0, %s71_s0 }
   0x7   :  { %38 = vrot.lane.b32.xlu0 %v36_v0, %s93_s20 }
   0x8   :  { %p78_p4 = por %p77_p3, %p76_p2 }
   0xa   :  { %p79_p5 = pnand %p78_p4, %p72_p1 }
  0x79   :  { %v39_v3 = vpop.permute.xlu0 %38 }
  0x7a   :  { %v42_v4 = vsel %vm41_vm0, %v36_v0, %v39_v3 }
  0x7b   :  { %v45_v5 = vadd.f32 %v44_v2, %v42_v4 }
  0x7d   :  { %47 = vst.msk [vmem:[#allocation4] sm:$0xff] %vm46_vm1, %v45_v5 }
  0x7e   :  { %82 = shalt.err (!%p79_p5)
}
  0x7f   :  { %57 = dma.vmem_to_hbm [thread:$0]  %s55_s24, 128, %s133_s3, [#allocation5]  }
  0x80   :  { %91 = dma.done.wait [#allocation5], 128  }
  0x81   :  { %92 = vsyncadd [#allocation5], 4294967168 }
  0x82   :  { %61 = vsyncpa [#allocation5], 1 }

</bundles_post_ra>
